<compile_context>
chip_gen: v7x
topology: tpu7x:2x2x1
jax: 0.10.0
libtpu: 0.0.40
codegen_flags: <defaults>
</compile_context>

<pallas_src>
import functools
import math

import jax
import jax.numpy as jnp
from jax import lax
from jax.experimental import pallas as pl
from jax.experimental.pallas import tpu as pltpu


_VMEM_LIMIT = 32 * 1024 * 1024  # safe explicit scoped-VMEM budget (v5e/v6e/v7x)
_PAD = 8                        # sublane-aligned zero-column pad inside conv slabs


def _ceil_to(x, m):
    return ((x + m - 1) // m) * m


def _row_tile(m, candidates):
    """Largest candidate tile that divides m (m is a multiple of 8 here)."""
    for t in candidates:
        if m % t == 0:
            return t
    return m


# --------------------------------------------------------------------------
# Kernel 1: fused timestep-MLP + label('y')-MLP embedding (one launch, M=B)
# --------------------------------------------------------------------------

def _emb_kernel(t_ref, y_ref,
                wt1_ref, bt1_ref, wt2_ref, bt2_ref,
                wy1_ref, by1_ref, wy2_ref, by2_ref,
                o_ref, *, use_y):
    def mlp(x, w1, b1, w2, b2):
        h = jnp.dot(x.astype(jnp.bfloat16), w1[...],
                    preferred_element_type=jnp.float32) + b1[...]
        h = h * jax.nn.sigmoid(h)                      # SiLU in f32
        return jnp.dot(h.astype(jnp.bfloat16), w2[...],
                       preferred_element_type=jnp.float32) + b2[...]

    emb = mlp(t_ref[...], wt1_ref, bt1_ref, wt2_ref, bt2_ref)
    if use_y:
        emb = emb + mlp(y_ref[...], wy1_ref, by1_ref, wy2_ref, by2_ref)
    o_ref[...] = emb.astype(o_ref.dtype)


def pallas_time_label_embed(t_emb, y, wt1, bt1, wt2, bt2,
                            wy1, by1, wy2, by2, *, use_y):
    B, C = t_emb.shape
    arrays = [t_emb, y, wt1, bt1.reshape(1, -1), wt2, bt2.reshape(1, -1),
              wy1, by1.reshape(1, -1), wy2, by2.reshape(1, -1)]

    def full(shape):
        n = len(shape)
        return pl.BlockSpec(shape, lambda i, n=n: (0,) * n)

    return pl.pallas_call(
        functools.partial(_emb_kernel, use_y=use_y),
        out_shape=jax.ShapeDtypeStruct((B, C), jnp.float32),
        grid_spec=pltpu.PrefetchScalarGridSpec(
            num_scalar_prefetch=0,
            grid=(1,),
            in_specs=[full(a.shape) for a in arrays],
            out_specs=full((B, C)),
        ),
        compiler_params=pltpu.CompilerParams(
            dimension_semantics=("arbitrary",),
            vmem_limit_bytes=_VMEM_LIMIT),
    )(*arrays)


# --------------------------------------------------------------------------
# Kernel 2: 3x3 conv_in (Cin=4 -> C), fully in-kernel, fused SiLU, bf16 output
# --------------------------------------------------------------------------

def _conv_in_kernel(top_ref, mid_ref, bot_ref, w_ref, b_ref, o_ref,
                    slab_ref, acc_ref, *, tile_h, w_img, c_in):
    i = pl.program_id(1)
    last = pl.num_programs(1) - 1
    n_pix = tile_h * w_img
    tscale = jnp.where(i == 0, 0.0, 1.0)      # zero top halo row on first tile
    bscale = jnp.where(i == last, 0.0, 1.0)   # zero bottom halo row on last tile

    # slab columns: [0:_PAD) zeros | [_PAD:_PAD+W) data | [_PAD+W:_PAD+W+_PAD) zeros
    zcols = jnp.zeros((tile_h + 2, _PAD, c_in), slab_ref.dtype)
    slab_ref[:, 0:_PAD, :] = zcols
    slab_ref[:, _PAD + w_img:_PAD + w_img + _PAD, :] = zcols
    slab_ref[0:1, _PAD:_PAD + w_img, :] = (top_ref[0] * tscale).astype(slab_ref.dtype)
    slab_ref[1:tile_h + 1, _PAD:_PAD + w_img, :] = mid_ref[0].astype(slab_ref.dtype)
    slab_ref[tile_h + 1:tile_h + 2, _PAD:_PAD + w_img, :] = (
        bot_ref[0] * bscale).astype(slab_ref.dtype)

    # 9 taps, K=4 each, accumulated in a VMEM f32 scratch (no vreg spill).
    first = True
    for dy in range(3):
        for dx in range(3):
            t = dy * 3 + dx
            c0 = _PAD - 1 + dx
            piece = slab_ref[dy:dy + tile_h, c0:c0 + w_img, :]
            piece = piece.reshape(n_pix, c_in)
            part = jnp.dot(piece, w_ref[t], preferred_element_type=jnp.float32)
            if first:
                acc_ref[...] = part
                first = False
            else:
                acc_ref[...] += part

    h = acc_ref[...] + b_ref[...]
    h = h * jax.nn.sigmoid(h)                 # fused SiLU
    o_ref[0] = h.astype(o_ref.dtype)


def pallas_conv_in(x_nhwc, w9, b):
    """3x3 'same' conv Cin -> C with fused SiLU.

    x_nhwc: [B, H, W, Cin] f32, w9: [9, Cin, C] bf16, b: [C] f32
    returns [B, H*W, C] bf16
    """
    B, H, W, Cin = x_nhwc.shape
    C = w9.shape[-1]
    tile_h = _row_tile(H, (32, 16, 8))
    kernel = functools.partial(_conv_in_kernel, tile_h=tile_h, w_img=W, c_in=Cin)
    return pl.pallas_call(
        kernel,
        out_shape=jax.ShapeDtypeStruct((B, H * W, C), jnp.bfloat16),
        grid_spec=pltpu.PrefetchScalarGridSpec(
            num_scalar_prefetch=0,
            grid=(B, H // tile_h),
            in_specs=[
                # top halo row (clamped; zeroed in-kernel for the first tile)
                pl.BlockSpec((1, 1, W, Cin),
                             lambda b, i: (b, jnp.maximum(i * tile_h - 1, 0), 0, 0)),
                # main tile rows
                pl.BlockSpec((1, tile_h, W, Cin), lambda b, i: (b, i, 0, 0)),
                # bottom halo row (clamped; zeroed in-kernel for the last tile)
                pl.BlockSpec((1, 1, W, Cin),
                             lambda b, i: (b, jnp.minimum((i + 1) * tile_h, H - 1), 0, 0)),
                pl.BlockSpec((9, Cin, C), lambda b, i: (0, 0, 0)),
                pl.BlockSpec((1, C), lambda b, i: (0, 0)),
            ],
            out_specs=pl.BlockSpec((1, tile_h * W, C), lambda b, i: (b, i, 0)),
            scratch_shapes=[
                pltpu.VMEM((tile_h + 2, W + 2 * _PAD, Cin), jnp.bfloat16),
                pltpu.VMEM((tile_h * W, C), jnp.float32),
            ],
        ),
        compiler_params=pltpu.CompilerParams(
            dimension_semantics=("parallel", "parallel"),
            vmem_limit_bytes=_VMEM_LIMIT),
    )(x_nhwc, x_nhwc, x_nhwc, w9, b.reshape(1, C))


# --------------------------------------------------------------------------
# Kernel 3: fused k/v projection of the (padded) context, k pre-transposed
# --------------------------------------------------------------------------

def _kv_proj_kernel(ctx_ref, wkv_ref, kt_ref, v_ref, *, c_dim):
    ctx = ctx_ref[0].astype(jnp.bfloat16)                         # [S_pad, Dc]
    kv = jnp.dot(ctx, wkv_ref[...],
                 preferred_element_type=jnp.float32)              # [S_pad, 2C]
    # k transposed once per batch element (outside the attention hot loop)
    kt_ref[0] = jnp.transpose(kv[:, :c_dim]).astype(kt_ref.dtype)  # [C, S_pad]
    v_ref[0] = kv[:, c_dim:].astype(v_ref.dtype)                   # [S_pad, C]


def pallas_kv_proj(ctx, wkv, *, c_dim):
    B, S, Dc = ctx.shape
    return pl.pallas_call(
        functools.partial(_kv_proj_kernel, c_dim=c_dim),
        out_shape=(jax.ShapeDtypeStruct((B, c_dim, S), jnp.bfloat16),
                   jax.ShapeDtypeStruct((B, S, c_dim), jnp.bfloat16)),
        grid_spec=pltpu.PrefetchScalarGridSpec(
            num_scalar_prefetch=0,
            grid=(B,),
            in_specs=[
                pl.BlockSpec((1, S, Dc), lambda b: (b, 0, 0)),
                pl.BlockSpec((Dc, 2 * c_dim), lambda b: (0, 0)),
            ],
            out_specs=(pl.BlockSpec((1, c_dim, S), lambda b: (b, 0, 0)),
                       pl.BlockSpec((1, S, c_dim), lambda b: (b, 0, 0))),
        ),
        compiler_params=pltpu.CompilerParams(
            dimension_semantics=("parallel",),
            vmem_limit_bytes=_VMEM_LIMIT),
    )(ctx, wkv)


# --------------------------------------------------------------------------
# Kernel 4: cross-attention (+ time-emb add, + residual), tiled over HW
# --------------------------------------------------------------------------

def _cross_attn_kernel(h_ref, temb_ref, kt_ref, v_ref, wq_ref, wo_ref, o_ref,
                       *, s_real):
    h = h_ref[0].astype(jnp.float32) + temb_ref[0]               # [tile_q, C] f32
    # 1/sqrt(C) is folded into wq at init time.
    q = jnp.dot(h.astype(jnp.bfloat16), wq_ref[...],
                preferred_element_type=jnp.float32)              # [tile_q, C]
    # scores: plain matmul against the pre-transposed k
    s = jnp.dot(q.astype(jnp.bfloat16), kt_ref[0],
                preferred_element_type=jnp.float32)              # [tile_q, S_pad]
    # mask the zero-padded context positions
    col = lax.broadcasted_iota(jnp.int32, s.shape, 1)
    s = jnp.where(col < s_real, s, -1e30)
    s = s - jnp.max(s, axis=-1, keepdims=True)
    p = jnp.exp(s)
    p = p * pl.reciprocal(jnp.sum(p, axis=-1, keepdims=True), approx=True)
    a = jnp.dot(p.astype(jnp.bfloat16), v_ref[0],
                preferred_element_type=jnp.float32)              # [tile_q, C]
    out = h + jnp.dot(a.astype(jnp.bfloat16), wo_ref[...],
                      preferred_element_type=jnp.float32)
    o_ref[0] = out.astype(o_ref.dtype)


def pallas_cross_attention(h, temb, k_t, v, wq, wo, *, s_real):
    """h:[B,HW,C] bf16, temb:[B,1,C] f32, k_t:[B,C,S_pad], v:[B,S_pad,C] bf16."""
    B, HW, C = h.shape
    S_pad = v.shape[1]
    tile_q = _row_tile(HW, (1024, 512, 256, 128, 64, 32, 16, 8))
    return pl.pallas_call(
        functools.partial(_cross_attn_kernel, s_real=s_real),
        out_shape=jax.ShapeDtypeStruct((B, HW, C), jnp.bfloat16),
        grid_spec=pltpu.PrefetchScalarGridSpec(
            num_scalar_prefetch=0,
            grid=(B, HW // tile_q),
            in_specs=[
                pl.BlockSpec((1, tile_q, C), lambda b, i: (b, i, 0)),
                pl.BlockSpec((1, 1, C), lambda b, i: (b, 0, 0)),
                pl.BlockSpec((1, C, S_pad), lambda b, i: (b, 0, 0)),
                pl.BlockSpec((1, S_pad, C), lambda b, i: (b, 0, 0)),
                pl.BlockSpec((C, C), lambda b, i: (0, 0)),
                pl.BlockSpec((C, C), lambda b, i: (0, 0)),
            ],
            out_specs=pl.BlockSpec((1, tile_q, C), lambda b, i: (b, i, 0)),
        ),
        compiler_params=pltpu.CompilerParams(
            dimension_semantics=("parallel", "parallel"),
            vmem_limit_bytes=_VMEM_LIMIT),
    )(h, temb, k_t, v, wq, wo)


# --------------------------------------------------------------------------
# Kernel 5: 3x3 conv_out, in-kernel halos (rows AND columns), single K=9*C
#           matmul over a VMEM im2col slab, lane-dense bf16 output
# --------------------------------------------------------------------------

def _conv_out_kernel(top_ref, mid_ref, bot_ref, w_ref, b_ref, o_ref,
                     slab_ref, col_ref, *, tile_h, w_img, c):
    i = pl.program_id(1)
    last = pl.num_programs(1) - 1
    n_pix = tile_h * w_img
    tscale = jnp.where(i == 0, 0.0, 1.0)      # zero top halo row on first tile
    bscale = jnp.where(i == last, 0.0, 1.0)   # zero bottom halo row on last tile

    # slab columns: [0:_PAD) zeros | [_PAD:_PAD+W) data | [_PAD+W:..) zeros
    # (all stores sublane-aligned; no wrapper-side jnp.pad of h needed)
    zcols = jnp.zeros((tile_h + 2, _PAD, c), slab_ref.dtype)
    slab_ref[:, 0:_PAD, :] = zcols
    slab_ref[:, _PAD + w_img:_PAD + w_img + _PAD, :] = zcols
    slab_ref[0:1, _PAD:_PAD + w_img, :] = (top_ref[0] * tscale).astype(slab_ref.dtype)
    slab_ref[1:tile_h + 1, _PAD:_PAD + w_img, :] = mid_ref[0].astype(slab_ref.dtype)
    slab_ref[tile_h + 1:tile_h + 2, _PAD:_PAD + w_img, :] = (
        bot_ref[0] * bscale).astype(slab_ref.dtype)

    # gather the 9 taps into a VMEM im2col slab (lane-aligned column stores),
    # then ONE K=9*C matmul so the MXU accumulates internally (no f32 vreg acc).
    for dy in range(3):
        for dx in range(3):
            t = dy * 3 + dx
            c0 = _PAD - 1 + dx
            piece = slab_ref[dy:dy + tile_h, c0:c0 + w_img, :]
            col_ref[:, t * c:(t + 1) * c] = piece.reshape(n_pix, c)

    out = jnp.dot(col_ref[...], w_ref[...],
                  preferred_element_type=jnp.float32) + b_ref[...]
    o_ref[0] = out.astype(o_ref.dtype)


def pallas_conv3x3_out(h_img, w_flat, b):
    """3x3 'same' conv C -> n_out (lane-dense, out channels padded to 128).

    h_img: [B, H, W, C] bf16 (no spatial padding), w_flat: [9*C, n_out] bf16,
    b: [n_out] f32.  returns [B, H*W, n_out] bf16
    """
    B, H, W, C = h_img.shape
    n_out = w_flat.shape[-1]
    tile_h = _row_tile(H, (32, 16, 8))
    kernel = functools.partial(_conv_out_kernel, tile_h=tile_h, w_img=W, c=C)
    return pl.pallas_call(
        kernel,
        out_shape=jax.ShapeDtypeStruct((B, H * W, n_out), jnp.bfloat16),
        grid_spec=pltpu.PrefetchScalarGridSpec(
            num_scalar_prefetch=0,
            grid=(B, H // tile_h),
            in_specs=[
                pl.BlockSpec((1, 1, W, C),
                             lambda b, i: (b, jnp.maximum(i * tile_h - 1, 0), 0, 0)),
                pl.BlockSpec((1, tile_h, W, C), lambda b, i: (b, i, 0, 0)),
                pl.BlockSpec((1, 1, W, C),
                             lambda b, i: (b, jnp.minimum((i + 1) * tile_h, H - 1), 0, 0)),
                pl.BlockSpec((9 * C, n_out), lambda b, i: (0, 0)),
                pl.BlockSpec((1, n_out), lambda b, i: (0, 0)),
            ],
            out_specs=pl.BlockSpec((1, tile_h * W, n_out), lambda b, i: (b, i, 0)),
            scratch_shapes=[
                pltpu.VMEM((tile_h + 2, W + 2 * _PAD, C), jnp.bfloat16),
                pltpu.VMEM((tile_h * W, 9 * C), jnp.bfloat16),
            ],
        ),
        compiler_params=pltpu.CompilerParams(
            dimension_semantics=("parallel", "parallel"),
            vmem_limit_bytes=_VMEM_LIMIT),
    )(h_img, h_img, h_img, w_flat, b.reshape(1, n_out))


# --------------------------------------------------------------------------
# Plain-JAX glue (tiny / metadata-only ops)
# --------------------------------------------------------------------------

def timestep_embedding(t, dim, max_period=10000.0):
    half = dim // 2
    freqs = jnp.exp(
        -math.log(max_period) * jnp.arange(half, dtype=jnp.float32) / half)
    args = t.astype(jnp.float32)[:, None] * freqs[None, :]
    return jnp.concatenate([jnp.cos(args), jnp.sin(args)], axis=-1)   # [B, dim]


class TrtUnetPallas:
    """Pallas stand-in for TrtUnet (opaque TRT UNet engine)."""

    def __init__(self, key, in_channels=4, out_channels=4, model_channels=128,
                 context_dim=256, adm_in_channels=256, time_embed_dim=256):
        C = model_channels
        ks = jax.random.split(key, 10)

        def init(k, shape, fan_in, scale=1.0):
            w = jax.random.normal(k, shape, jnp.float32) * (scale / math.sqrt(fan_in))
            return w.astype(jnp.bfloat16)        # MXU operands stored in bf16

        self.in_channels = in_channels
        self.out_channels = out_channels
        self.C = C
        self.context_dim = context_dim
        self.adm_in_channels = adm_in_channels

        # timestep embedding MLP
        self.w_t1 = init(ks[0], (C, time_embed_dim), C)
        self.b_t1 = jnp.zeros((time_embed_dim,), jnp.float32)
        self.w_t2 = init(ks[1], (time_embed_dim, C), time_embed_dim)
        self.b_t2 = jnp.zeros((C,), jnp.float32)
        # label ('y') embedding MLP (num_classes='sequential' path)
        self.w_y1 = init(ks[2], (adm_in_channels, time_embed_dim), adm_in_channels)
        self.b_y1 = jnp.zeros((time_embed_dim,), jnp.float32)
        self.w_y2 = init(ks[3], (time_embed_dim, C), time_embed_dim)
        self.b_y2 = jnp.zeros((C,), jnp.float32)
        # conv_in 3x3 (in_channels -> C): per-tap weights [9, Cin, C]
        # TODO(synk): if real conv weights are ever loaded, verify the
        # tap order (t = dy*3 + dx) against the original weight layout.
        self.w_cin = init(ks[4], (9, in_channels, C), 9 * in_channels)
        self.b_cin = jnp.zeros((C,), jnp.float32)
        # cross-attention projections; 1/sqrt(C) folded into w_q, k/v fused
        self.w_q = init(ks[5], (C, C), C, scale=1.0 / math.sqrt(C))
        self.w_kv = init(ks[6], (context_dim, 2 * C), context_dim)
        self.w_o = init(ks[8], (C, C), C)
        # conv_out 3x3 (C -> out): flat [9*C, out_pad] weight, out padded to 128
        self.out_pad = _ceil_to(out_channels, 128)
        w_cout = jax.random.normal(ks[9], (9 * C, out_channels),
                                   jnp.float32) / math.sqrt(9 * C)
        self.w_cout = jnp.pad(
            w_cout, ((0, 0), (0, self.out_pad - out_channels))).astype(jnp.bfloat16)
        self.b_cout = jnp.zeros((self.out_pad,), jnp.float32)

    def __call__(self, x, timesteps, context, *args, **kwargs):
        # --- TrtUnet.forward semantics: feed_dict float casts + shape check ---
        x = x.astype(jnp.float32)
        timesteps = timesteps.astype(jnp.float32)
        context = context.astype(jnp.float32)
        y = kwargs.get("y", None)
        if x.shape[-1] % 8 or x.shape[-2] % 8:
            # message kept verbatim from the original module (checks % 8)
            raise ValueError(
                'Input shape must be divisible by 64 in both dimensions.')

        B, Cin, H, W = x.shape
        C = self.C

        # fused timestep-MLP + y-MLP embedding (single Pallas launch)
        t_sin = timestep_embedding(timesteps, C)                        # [B, C]
        y_in = (y.astype(jnp.float32) if y is not None
                else jnp.zeros((B, self.adm_in_channels), jnp.float32))
        emb = pallas_time_label_embed(
            t_sin, y_in,
            self.w_t1, self.b_t1, self.w_t2, self.b_t2,
            self.w_y1, self.b_y1, self.w_y2, self.b_y2,
            use_y=y is not None)                                        # [B, C]

        # conv_in (3x3) fully in-kernel (row halos), fused SiLU, bf16 output
        x_nhwc = jnp.transpose(x, (0, 2, 3, 1))                         # [B,H,W,Cin]
        h = pallas_conv_in(x_nhwc, self.w_cin, self.b_cin)              # [B,HW,C] bf16

        # context: zero-pad S to a 128 multiple, fused k/v projection,
        # k emitted pre-transposed [B, C, S_pad]
        S = context.shape[1]
        s_pad = _ceil_to(max(S, 1), 128)
        ctx_p = context if s_pad == S else jnp.pad(
            context, ((0, 0), (0, s_pad - S), (0, 0)))
        k_t, v_ctx = pallas_kv_proj(ctx_p, self.w_kv, c_dim=C)          # bf16

        # cross-attention over the context, tiled over HW, fused temb + residual
        h = pallas_cross_attention(h, emb.reshape(B, 1, C), k_t, v_ctx,
                                   self.w_q, self.w_o,
                                   s_real=max(S, 1))                    # [B,HW,C] bf16

        # conv_out (3x3) fully in-kernel: row AND column halos handled inside
        # the kernel, VMEM im2col + single K=9C matmul, lane-dense bf16 output.
        lat = pallas_conv3x3_out(h.reshape(B, H, W, C),
                                 self.w_cout, self.b_cout)              # [B,HW,128]
        latent = lat[:, :, :self.out_channels].astype(jnp.float32)
        latent = latent.reshape(B, H, W, self.out_channels)
        return jnp.transpose(latent, (0, 3, 1, 2))                      # NHWC -> NCHW


if __name__ == "__main__":
    key = jax.random.PRNGKey(0)
    k_model, kx, kt, kc, ky = jax.random.split(key, 5)

    model = TrtUnetPallas(k_model)

    # small shapes consistent with the module's interface
    x = jax.random.normal(kx, (2, 4, 16, 16), jnp.float32)       # divisible by 8
    timesteps = jax.random.uniform(kt, (2,), jnp.float32, 0.0, 999.0)
    context = jax.random.normal(kc, (2, 8, 256), jnp.float32)    # encoder_hidden_states
    y = jax.random.normal(ky, (2, 256), jnp.float32)             # adm conditioning

    out = model(x, timesteps, context, y=y)
    out = jax.block_until_ready(out)
    assert out.shape == (2, 4, 16, 16) and out.dtype == jnp.float32
    assert bool(jnp.all(jnp.isfinite(out)))
    print("KERNEL_OK")
</pallas_src>

<mosaic_0001>
module attributes {stable_mosaic.version = 11 : i64} {
  func.func @_emb_kernel(%arg0: i32, %arg1: memref<2x128xf32, #tpu.memory_space<vmem>>, %arg2: memref<2x256xf32, #tpu.memory_space<vmem>>, %arg3: memref<128x256xbf16, #tpu.memory_space<vmem>>, %arg4: memref<1x256xf32, #tpu.memory_space<vmem>>, %arg5: memref<256x128xbf16, #tpu.memory_space<vmem>>, %arg6: memref<1x128xf32, #tpu.memory_space<vmem>>, %arg7: memref<256x256xbf16, #tpu.memory_space<vmem>>, %arg8: memref<1x256xf32, #tpu.memory_space<vmem>>, %arg9: memref<256x128xbf16, #tpu.memory_space<vmem>>, %arg10: memref<1x128xf32, #tpu.memory_space<vmem>>, %arg11: memref<2x128xf32, #tpu.memory_space<vmem>>) attributes {dimension_semantics = [#tpu.dimension_semantics<arbitrary>], iteration_bounds = array<i64: 1>, scalar_prefetch = 0 : i64, scratch_operands = 0 : i64, tpu.core_type = #tpu.core_type<tc>, window_params = [{pipeline_mode = #tpu.pipeline_mode<synchronous>, transform_indices = @transform_0, window_bounds = array<i64: 2, 128>}, {pipeline_mode = #tpu.pipeline_mode<synchronous>, transform_indices = @transform_1, window_bounds = array<i64: 2, 256>}, {pipeline_mode = #tpu.pipeline_mode<synchronous>, transform_indices = @transform_2, window_bounds = array<i64: 128, 256>}, {pipeline_mode = #tpu.pipeline_mode<synchronous>, transform_indices = @transform_3, window_bounds = array<i64: 1, 256>}, {pipeline_mode = #tpu.pipeline_mode<synchronous>, transform_indices = @transform_4, window_bounds = array<i64: 256, 128>}, {pipeline_mode = #tpu.pipeline_mode<synchronous>, transform_indices = @transform_5, window_bounds = array<i64: 1, 128>}, {pipeline_mode = #tpu.pipeline_mode<synchronous>, transform_indices = @transform_6, window_bounds = array<i64: 256, 256>}, {pipeline_mode = #tpu.pipeline_mode<synchronous>, transform_indices = @transform_7, window_bounds = array<i64: 1, 256>}, {pipeline_mode = #tpu.pipeline_mode<synchronous>, transform_indices = @transform_8, window_bounds = array<i64: 256, 128>}, {pipeline_mode = #tpu.pipeline_mode<synchronous>, transform_indices = @transform_9, window_bounds = array<i64: 1, 128>}, {pipeline_mode = #tpu.pipeline_mode<synchronous>, transform_indices = @transform_10, window_bounds = array<i64: 2, 128>}]} {
    %c0 = arith.constant 0 : index
    %c0_0 = arith.constant 0 : index
    %0 = vector.load %arg1[%c0, %c0_0] : memref<2x128xf32, #tpu.memory_space<vmem>>, vector<2x128xf32>
    %1 = arith.truncf %0 : vector<2x128xf32> to vector<2x128xbf16>
    %c0_1 = arith.constant 0 : index
    %c0_2 = arith.constant 0 : index
    %2 = vector.load %arg3[%c0_1, %c0_2] : memref<128x256xbf16, #tpu.memory_space<vmem>>, vector<128x256xbf16>
    %cst = arith.constant dense<0.000000e+00> : vector<2x256xf32>
    %3 = tpu.matmul %1, %2, %cst {dimension_numbers = #tpu.dot_dimension_numbers<[1], [0], [0], [1], [0, 0, 1, 1], [], []>} : vector<2x128xbf16>, vector<128x256xbf16>, vector<2x256xf32> -> vector<2x256xf32>
    %c0_3 = arith.constant 0 : index
    %c0_4 = arith.constant 0 : index
    %4 = vector.load %arg4[%c0_3, %c0_4] : memref<1x256xf32, #tpu.memory_space<vmem>>, vector<1x256xf32>
    %5 = vector.broadcast %4 : vector<1x256xf32> to vector<2x256xf32>
    %6 = arith.addf %3, %5 : vector<2x256xf32>
    %7 = arith.negf %6 : vector<2x256xf32>
    %8 = math.exp %7 : vector<2x256xf32>
    %cst_5 = arith.constant 1.000000e+00 : f32
    %9 = vector.broadcast %cst_5 : f32 to vector<2x256xf32>
    %10 = arith.addf %9, %8 : vector<2x256xf32>
    %11 = arith.divf %9, %10 : vector<2x256xf32>
    %12 = arith.mulf %6, %11 : vector<2x256xf32>
    %13 = arith.truncf %12 : vector<2x256xf32> to vector<2x256xbf16>
    %c0_6 = arith.constant 0 : index
    %c0_7 = arith.constant 0 : index
    %14 = vector.load %arg5[%c0_6, %c0_7] : memref<256x128xbf16, #tpu.memory_space<vmem>>, vector<256x128xbf16>
    %cst_8 = arith.constant dense<0.000000e+00> : vector<2x128xf32>
    %15 = tpu.matmul %13, %14, %cst_8 {dimension_numbers = #tpu.dot_dimension_numbers<[1], [0], [0], [1], [0, 0, 1, 1], [], []>} : vector<2x256xbf16>, vector<256x128xbf16>, vector<2x128xf32> -> vector<2x128xf32>
    %c0_9 = arith.constant 0 : index
    %c0_10 = arith.constant 0 : index
    %16 = vector.load %arg6[%c0_9, %c0_10] : memref<1x128xf32, #tpu.memory_space<vmem>>, vector<1x128xf32>
    %17 = vector.broadcast %16 : vector<1x128xf32> to vector<2x128xf32>
    %18 = arith.addf %15, %17 : vector<2x128xf32>
    %c0_11 = arith.constant 0 : index
    %c0_12 = arith.constant 0 : index
    %19 = vector.load %arg2[%c0_11, %c0_12] : memref<2x256xf32, #tpu.memory_space<vmem>>, vector<2x256xf32>
    %20 = arith.truncf %19 : vector<2x256xf32> to vector<2x256xbf16>
    %c0_13 = arith.constant 0 : index
    %c0_14 = arith.constant 0 : index
    %21 = vector.load %arg7[%c0_13, %c0_14] : memref<256x256xbf16, #tpu.memory_space<vmem>>, vector<256x256xbf16>
    %cst_15 = arith.constant dense<0.000000e+00> : vector<2x256xf32>
    %22 = tpu.matmul %20, %21, %cst_15 {dimension_numbers = #tpu.dot_dimension_numbers<[1], [0], [0], [1], [0, 0, 1, 1], [], []>} : vector<2x256xbf16>, vector<256x256xbf16>, vector<2x256xf32> -> vector<2x256xf32>
    %c0_16 = arith.constant 0 : index
    %c0_17 = arith.constant 0 : index
    %23 = vector.load %arg8[%c0_16, %c0_17] : memref<1x256xf32, #tpu.memory_space<vmem>>, vector<1x256xf32>
    %24 = vector.broadcast %23 : vector<1x256xf32> to vector<2x256xf32>
    %25 = arith.addf %22, %24 : vector<2x256xf32>
    %26 = arith.negf %25 : vector<2x256xf32>
    %27 = math.exp %26 : vector<2x256xf32>
    %cst_18 = arith.constant 1.000000e+00 : f32
    %28 = vector.broadcast %cst_18 : f32 to vector<2x256xf32>
    %29 = arith.addf %28, %27 : vector<2x256xf32>
    %30 = arith.divf %28, %29 : vector<2x256xf32>
    %31 = arith.mulf %25, %30 : vector<2x256xf32>
    %32 = arith.truncf %31 : vector<2x256xf32> to vector<2x256xbf16>
    %c0_19 = arith.constant 0 : index
    %c0_20 = arith.constant 0 : index
    %33 = vector.load %arg9[%c0_19, %c0_20] : memref<256x128xbf16, #tpu.memory_space<vmem>>, vector<256x128xbf16>
    %cst_21 = arith.constant dense<0.000000e+00> : vector<2x128xf32>
    %34 = tpu.matmul %32, %33, %cst_21 {dimension_numbers = #tpu.dot_dimension_numbers<[1], [0], [0], [1], [0, 0, 1, 1], [], []>} : vector<2x256xbf16>, vector<256x128xbf16>, vector<2x128xf32> -> vector<2x128xf32>
    %c0_22 = arith.constant 0 : index
    %c0_23 = arith.constant 0 : index
    %35 = vector.load %arg10[%c0_22, %c0_23] : memref<1x128xf32, #tpu.memory_space<vmem>>, vector<1x128xf32>
    %36 = vector.broadcast %35 : vector<1x128xf32> to vector<2x128xf32>
    %37 = arith.addf %34, %36 : vector<2x128xf32>
    %38 = arith.addf %18, %37 : vector<2x128xf32>
    %c0_24 = arith.constant 0 : index
    %c0_25 = arith.constant 0 : index
    %39 = vector.load %arg11[%c0_24, %c0_25] : memref<2x128xf32, #tpu.memory_space<vmem>>, vector<2x128xf32>
    tpu.vector_store %arg11[%c0_24, %c0_25], %38 {strides = array<i32>} : memref<2x128xf32, #tpu.memory_space<vmem>>, vector<2x128xf32>,
    return
  }
  func.func @transform_0(%arg0: i32) -> (i32, i32) {
    %c0_i32 = arith.constant 0 : i32
    %c0_i32_0 = arith.constant 0 : i32
    %c0_i32_1 = arith.constant 0 : i32
    return %c0_i32, %c0_i32_0 : i32, i32
  }
  func.func @transform_1(%arg0: i32) -> (i32, i32) {
    %c0_i32 = arith.constant 0 : i32
    %c0_i32_0 = arith.constant 0 : i32
    %c0_i32_1 = arith.constant 0 : i32
    return %c0_i32, %c0_i32_0 : i32, i32
  }
  func.func @transform_2(%arg0: i32) -> (i32, i32) {
    %c0_i32 = arith.constant 0 : i32
    %c0_i32_0 = arith.constant 0 : i32
    %c0_i32_1 = arith.constant 0 : i32
    return %c0_i32, %c0_i32_0 : i32, i32
  }
  func.func @transform_3(%arg0: i32) -> (i32, i32) {
    %c0_i32 = arith.constant 0 : i32
    %c0_i32_0 = arith.constant 0 : i32
    %c0_i32_1 = arith.constant 0 : i32
    return %c0_i32, %c0_i32_0 : i32, i32
  }
  func.func @transform_4(%arg0: i32) -> (i32, i32) {
    %c0_i32 = arith.constant 0 : i32
    %c0_i32_0 = arith.constant 0 : i32
    %c0_i32_1 = arith.constant 0 : i32
    return %c0_i32, %c0_i32_0 : i32, i32
  }
  func.func @transform_5(%arg0: i32) -> (i32, i32) {
    %c0_i32 = arith.constant 0 : i32
    %c0_i32_0 = arith.constant 0 : i32
    %c0_i32_1 = arith.constant 0 : i32
    return %c0_i32, %c0_i32_0 : i32, i32
  }
  func.func @transform_6(%arg0: i32) -> (i32, i32) {
    %c0_i32 = arith.constant 0 : i32
    %c0_i32_0 = arith.constant 0 : i32
    %c0_i32_1 = arith.constant 0 : i32
    return %c0_i32, %c0_i32_0 : i32, i32
  }
  func.func @transform_7(%arg0: i32) -> (i32, i32) {
    %c0_i32 = arith.constant 0 : i32
    %c0_i32_0 = arith.constant 0 : i32
    %c0_i32_1 = arith.constant 0 : i32
    return %c0_i32, %c0_i32_0 : i32, i32
  }
  func.func @transform_8(%arg0: i32) -> (i32, i32) {
    %c0_i32 = arith.constant 0 : i32
    %c0_i32_0 = arith.constant 0 : i32
    %c0_i32_1 = arith.constant 0 : i32
    return %c0_i32, %c0_i32_0 : i32, i32
  }
  func.func @transform_9(%arg0: i32) -> (i32, i32) {
    %c0_i32 = arith.constant 0 : i32
    %c0_i32_0 = arith.constant 0 : i32
    %c0_i32_1 = arith.constant 0 : i32
    return %c0_i32, %c0_i32_0 : i32, i32
  }
  func.func @transform_10(%arg0: i32) -> (i32, i32) {
    %c0_i32 = arith.constant 0 : i32
    %c0_i32_0 = arith.constant 0 : i32
    %c0_i32_1 = arith.constant 0 : i32
    return %c0_i32, %c0_i32_0 : i32, i32
  }
}

</mosaic_0001>

<bundles_post_ra>
// kernel: tpu_custom_call.1
= control target key start
LH: loop header
LB: loop body
LE: loop exit
PB: predicated region body
PF: predicated region fallthrough
CT: control target
= control target key end

     0   :  { %15 = vsyncpa [#allocation3], 0  ;;  %s1550_s0 = inlined_call_operand.hbm [shape: f32[2,128], index: 0, kind: input, shape index: {}]   ;;  %s1551_s1 = inlined_call_operand.hbm [shape: f32[2,256], index: 1, kind: input, shape index: {}]   ;;  %s1552_s2 = inlined_call_operand.hbm [shape: bf16[128,256], index: 2, kind: input, shape index: {}]   ;;  %s1553_s3 = inlined_call_operand.vmem [shape: f32[1,256], index: 3, kind: input, shape index: {}]   ;;  %s1554_s4 = inlined_call_operand.hbm [shape: bf16[256,128], index: 4, kind: input, shape index: {}]   ;;  %s1555_s5 = inlined_call_operand.vmem [shape: f32[1,128], index: 5, kind: input, shape index: {}]   ;;  %s1556_s6 = inlined_call_operand.hbm [shape: bf16[256,256], index: 6, kind: input, shape index: {}]   ;;  %s1557_s7 = inlined_call_operand.vmem [shape: f32[1,256], index: 7, kind: input, shape index: {}]   ;;  %s1558_s8 = inlined_call_operand.hbm [shape: bf16[256,128], index: 8, kind: input, shape index: {}]   ;;  %s1559_s9 = inlined_call_operand.vmem [shape: f32[1,128], index: 9, kind: input, shape index: {}]   ;;  %s1560_s10 = inlined_call_operand.hbm [shape: f32[2,128], index: 10, kind: output, shape index: {}]  }
   0x1   :  { %16 = vsyncpa [#allocation6], 0 }
   0x2   :  { %17 = vsyncpa [#allocation9], 0 }
   0x3   :  { %18 = vsyncpa [#allocation12], 0 }
   0x4   :  { %19 = vsyncpa [#allocation4], 0  ;;  %s1354_s13 = smov [#allocation5]   ;;  %s1355_s15 = smov [#allocation8]  }
   0x5   :  { %s36_s14 = sshll.u32 %s1354_s13, 4  ;;  %s59_s16 = sshll.u32 %s1355_s15, 4  ;;  %s37_s14 = int_to_ptr.vmem [resolvable:$true] %s36_s14  ;;  %s1421_s16 = int_to_ptr.vmem [resolvable:$true] %s59_s16 }
   0x6   :  { %s1190_s19 = scalar_lea.hbm %s1551_s1, 64 }
   0x7   :  { %p1191_p0 = scmp.ne.s32.totalorder %s1551_s1, %s1190_s19  ;;  %p1194_p1 = scmp.lt.u32.totalorder %s1190_s19, %s1551_s1 }
   0x9   :  { %p1196_p2 = pnand %p1194_p1, %p1191_p0 }
   0xb   :  { %1199 = shalt.err (!%p1196_p2)
}
   0xc   :  { %s1200_s24 = scalar_lea.vmem %s37_s14, 64  ;;  %p1205_p4 = scmp.lt.s32.totalorder %s37_s14, %s37_s14 }
   0xd   :  { %p1201_p3 = scmp.ne.s32.totalorder %s37_s14, %s1200_s24  ;;  %p1206_p5 = scmp.lt.s32.totalorder %s1200_s24, %s1200_s24 }
   0xf   :  { %p1207_p6 = por %p1206_p5, %p1205_p4 }
  0x11   :  { %p1208_p7 = pnand %p1207_p6, %p1201_p3 }
  0x13   :  { %1211 = shalt.err (!%p1208_p7)
}
  0x14   :  { %39 = dma.hbm_to_vmem [thread:$0]  %s1551_s1, 64, %s37_s14, [#allocation6]  }
  0x15   :  { %s1212_s29 = scalar_lea.hbm %s1554_s4, 2048 }
  0x16   :  { %p1213_p8 = scmp.ne.s32.totalorder %s1554_s4, %s1212_s29  ;;  %p1216_p9 = scmp.lt.u32.totalorder %s1212_s29, %s1554_s4 }
  0x18   :  { %p1218_p10 = pnand %p1216_p9, %p1213_p8 }
  0x1a   :  { %1221 = shalt.err (!%p1218_p10)
}
  0x1b   :  { %s1222_s15 = scalar_lea.vmem %s1421_s16, 2048  ;;  %p1227_p12 = scmp.lt.s32.totalorder %s1421_s16, %s1421_s16 }
  0x1c   :  { %p1223_p11 = scmp.ne.s32.totalorder %s1421_s16, %s1222_s15  ;;  %p1228_p13 = scmp.lt.s32.totalorder %s1222_s15, %s1222_s15 }
  0x1e   :  { %p1229_p0 = por %p1228_p13, %p1227_p12 }
  0x20   :  { %p1230_p1 = pnand %p1229_p0, %p1223_p11 }
  0x22   :  { %1233 = shalt.err (!%p1230_p1)
}
  0x23   :  { %s1356_s1 = smov 64   ;;  %s1357_s14 = smov 4  }
  0x24   :  { %65 = dma.hbm_to_vmem [thread:$0]  %s1554_s4, 2048, %s1421_s16, [#allocation9], %s1356_s1, %s1356_s1, %s1357_s14  }
  0x25   :  { %s1358_s19 = smov [#allocation2]   ;;  %s1359_s21 = smov [#allocation7]  }
  0x26   :  { %s26_s20 = sshll.u32 %s1358_s19, 4  ;;  %s45_s22 = sshll.u32 %s1359_s21, 4  ;;  %s27_s20 = int_to_ptr.vmem [resolvable:$true] %s26_s20  ;;  %s1455_s22 = int_to_ptr.vmem [resolvable:$true] %s45_s22 }
  0x27   :  { %s1234_s25 = scalar_lea.hbm %s1550_s0, 32 }
  0x28   :  { %p1235_p2 = scmp.ne.s32.totalorder %s1550_s0, %s1234_s25  ;;  %p1238_p3 = scmp.lt.u32.totalorder %s1234_s25, %s1550_s0 }
  0x2a   :  { %p1240_p4 = pnand %p1238_p3, %p1235_p2 }
  0x2c   :  { %1243 = shalt.err (!%p1240_p4)
}
  0x2d   :  { %s1244_s4 = scalar_lea.vmem %s27_s20, 32  ;;  %p1249_p6 = scmp.lt.s32.totalorder %s27_s20, %s27_s20 }
  0x2e   :  { %p1245_p5 = scmp.ne.s32.totalorder %s27_s20, %s1244_s4  ;;  %p1250_p7 = scmp.lt.s32.totalorder %s1244_s4, %s1244_s4 }
  0x30   :  { %p1251_p8 = por %p1250_p7, %p1249_p6 }
  0x32   :  { %p1252_p9 = pnand %p1251_p8, %p1245_p5 }
  0x34   :  { %1255 = shalt.err (!%p1252_p9)
}
  0x35   :  { %29 = dma.hbm_to_vmem [thread:$0]  %s1550_s0, 32, %s27_s20, [#allocation3]  }
  0x36   :  { %s1256_s13 = scalar_lea.hbm %s1552_s2, 2048 }
  0x37   :  { %p1257_p10 = scmp.ne.s32.totalorder %s1552_s2, %s1256_s13  ;;  %p1260_p11 = scmp.lt.u32.totalorder %s1256_s13, %s1552_s2 }
  0x39   :  { %p1262_p12 = pnand %p1260_p11, %p1257_p10 }
  0x3b   :  { %1265 = shalt.err (!%p1262_p12)
}
  0x3c   :  { %s1266_s21 = scalar_lea.vmem %s1455_s22, 2048  ;;  %p1271_p0 = scmp.lt.s32.totalorder %s1455_s22, %s1455_s22 }
  0x3d   :  { %p1267_p13 = scmp.ne.s32.totalorder %s1455_s22, %s1266_s21  ;;  %p1272_p1 = scmp.lt.s32.totalorder %s1266_s21, %s1266_s21 }
  0x3f   :  { %p1273_p2 = por %p1272_p1, %p1271_p0 }
  0x41   :  { %p1274_p3 = pnand %p1273_p2, %p1267_p13 }
  0x43   :  { %1277 = shalt.err (!%p1274_p3)
}
  0x44   :  { %s1360_s0 = smov 128   ;;  %s1361_s20 = smov 8  }
  0x45   :  { %51 = dma.hbm_to_vmem [thread:$0]  %s1552_s2, 2048, %s1455_s22, [#allocation6], %s1360_s0, %s1360_s0, %s1361_s20  }
  0x46   :  { %s1362_s25 = smov [#allocation10]   ;;  %s1363_s27 = smov [#allocation11]  }
  0x47   :  { %s73_s26 = sshll.u32 %s1362_s25, 4  ;;  %s87_s28 = sshll.u32 %s1363_s27, 4  ;;  %s74_s26 = int_to_ptr.vmem [resolvable:$true] %s73_s26  ;;  %s1486_s28 = int_to_ptr.vmem [resolvable:$true] %s87_s28 }
  0x48   :  { %s1278_s16 = scalar_lea.hbm %s1556_s6, 4096 }
  0x49   :  { %p1279_p4 = scmp.ne.s32.totalorder %s1556_s6, %s1278_s16  ;;  %p1282_p5 = scmp.lt.u32.totalorder %s1278_s16, %s1556_s6 }
  0x4b   :  { %p1284_p6 = pnand %p1282_p5, %p1279_p4 }
  0x4d   :  { %1287 = shalt.err (!%p1284_p6)
}
  0x4e   :  { %s1288_s2 = scalar_lea.vmem %s74_s26, 4096  ;;  %p1293_p8 = scmp.lt.s32.totalorder %s74_s26, %s74_s26 }
  0x4f   :  { %p1289_p7 = scmp.ne.s32.totalorder %s74_s26, %s1288_s2  ;;  %p1294_p9 = scmp.lt.s32.totalorder %s1288_s2, %s1288_s2 }
  0x51   :  { %p1295_p10 = por %p1294_p9, %p1293_p8 }
  0x53   :  { %p1296_p11 = pnand %p1295_p10, %p1289_p7 }
  0x55   :  { %1299 = shalt.err (!%p1296_p11)
}
  0x56   :  { %79 = dma.hbm_to_vmem [thread:$0]  %s1556_s6, 4096, %s74_s26, [#allocation9], %s1360_s0, %s1360_s0, %s1361_s20  }
  0x57   :  { %s1300_s19 = scalar_lea.hbm %s1558_s8, 2048 }
  0x58   :  { %p1301_p12 = scmp.ne.s32.totalorder %s1558_s8, %s1300_s19  ;;  %p1304_p13 = scmp.lt.u32.totalorder %s1300_s19, %s1558_s8 }
  0x5a   :  { %p1306_p0 = pnand %p1304_p13, %p1301_p12 }
  0x5c   :  { %1309 = shalt.err (!%p1306_p0)
}
  0x5d   :  { %s1310_s27 = scalar_lea.vmem %s1486_s28, 2048  ;;  %p1315_p2 = scmp.lt.s32.totalorder %s1486_s28, %s1486_s28 }
  0x5e   :  { %p1311_p1 = scmp.ne.s32.totalorder %s1486_s28, %s1310_s27  ;;  %p1316_p3 = scmp.lt.s32.totalorder %s1310_s27, %s1310_s27 }
  0x60   :  { %p1317_p4 = por %p1316_p3, %p1315_p2 }
  0x62   :  { %p1318_p5 = pnand %p1317_p4, %p1311_p1 }
  0x64   :  { %1321 = shalt.err (!%p1318_p5)
}
  0x65   :  { %93 = dma.hbm_to_vmem [thread:$0]  %s1558_s8, 2048, %s1486_s28, [#allocation12], %s1356_s1, %s1356_s1, %s1357_s14  }
  0x66   :  { %1344 = dma.done.wait [#allocation3], 32  }
  0x67   :  { %1345 = vsyncadd [#allocation3], 4294967264 }
  0x68   :  { %1346 = dma.done.wait [#allocation6], 2112  }
  0x69   :  { %1347 = vsyncadd [#allocation6], 4294965184 }
  0x6a   :  { %1348 = dma.done.wait [#allocation9], 6144  }
  0x6b   :  { %1349 = vsyncadd [#allocation9], 4294961152 }
  0x6c   :  { %1350 = dma.done.wait [#allocation12], 2048  }
  0x6d   :  { %1351 = vsyncadd [#allocation12], 4294965248  ;;  %v1364_v0 = vmov 0   ;;  %v1070_v1 = vld [vmem:[#allocation7 + $0x4] ss:$8 sps:$4 sm:$0xff]   ;;  %v1146_v59 = vld [vmem:[#allocation8 + $0x50] sm:$0xff]  }
  0x6e   :  { %257 = vmatprep.mubr.bf16.mxu0 %v1364_v0  ;;  %v1072_v2 = vld [vmem:[#allocation7] ss:$8 sps:$4 sm:$0xff]   ;;  %225 = vmatprep.subr.bf16.mxu0 %v1070_v1  ;;  %v1073_v3 = vld [vmem:[#allocation7 + $0x14] ss:$8 sps:$4 sm:$0xff]   ;;  %v1075_v4 = vld [vmem:[#allocation7 + $0x10] ss:$8 sps:$4 sm:$0xff]  }
  0x6f   :  { %226 = vmatpush1.bf16.msra.mxu0 %v1072_v2  ;;  %v1076_v5 = vld [vmem:[#allocation7 + $0x24] ss:$8 sps:$4 sm:$0xff]   ;;  %v1078_v6 = vld [vmem:[#allocation7 + $0x20] ss:$8 sps:$4 sm:$0xff]   ;;  %v1079_v7 = vld [vmem:[#allocation7 + $0x34] ss:$8 sps:$4 sm:$0xff]  }
  0x70   :  { %227 = vmatprep.subr.bf16.mxu0 %v1073_v3  ;;  %v1081_v8 = vld [vmem:[#allocation7 + $0x30] ss:$8 sps:$4 sm:$0xff]   ;;  %v1082_v9 = vld [vmem:[#allocation7 + $0x44] ss:$8 sps:$4 sm:$0xff]   ;;  %v1084_v10 = vld [vmem:[#allocation7 + $0x40] ss:$8 sps:$4 sm:$0xff]  }
  0x71   :  { %v1085_v11 = vld [vmem:[#allocation7 + $0x54] ss:$8 sps:$4 sm:$0xff]   ;;  %v1087_v12 = vld [vmem:[#allocation7 + $0x50] ss:$8 sps:$4 sm:$0xff]   ;;  %v1088_v13 = vld [vmem:[#allocation7 + $0x64] ss:$8 sps:$4 sm:$0xff]  }
  0x72   :  { %v1090_v14 = vld [vmem:[#allocation7 + $0x60] ss:$8 sps:$4 sm:$0xff]   ;;  %v1091_v15 = vld [vmem:[#allocation7 + $0x74] ss:$8 sps:$4 sm:$0xff]   ;;  %v1093_v16 = vld [vmem:[#allocation7 + $0x70] ss:$8 sps:$4 sm:$0xff]  }
  0x73   :  { %228 = vmatpush1.bf16.msra.mxu0 %v1075_v4  ;;  %v115_v17 = vld [vmem:[#allocation2] sm:$0x3]  ;;  %v1096_v18 = vld [vmem:[#allocation10 + $0x4] ss:$8 sps:$4 sm:$0xff]   ;;  %v1094_v20 = vld [vmem:[#allocation10] ss:$8 sps:$4 sm:$0xff]  }
  0x74   :  { %229 = vmatprep.subr.bf16.mxu0 %v1076_v5  ;;  %v116_v19 = vpack.c.bf16 %v115_v17, %v115_v17  ;;  %v1099_v21 = vld [vmem:[#allocation10 + $0x14] ss:$8 sps:$4 sm:$0xff]   ;;  %v1097_v23 = vld [vmem:[#allocation10 + $0x10] ss:$8 sps:$4 sm:$0xff]   ;;  %v1102_v25 = vld [vmem:[#allocation10 + $0x24] ss:$8 sps:$4 sm:$0xff]  }
  0x75   :  { %v1520_v22 = vld.sshfl [vmem:[#allocation5] sm:$0x33 pattern:$0x76325410]  ;;  %v1100_v27 = vld [vmem:[#allocation10 + $0x20] ss:$8 sps:$4 sm:$0xff]  }
  0x76   :  { %v466_v24 = vcombine.high %v1520_v22, %v1520_v22  ;;  %v1105_v28 = vld [vmem:[#allocation10 + $0x34] ss:$8 sps:$4 sm:$0xff]   ;;  %v1103_v29 = vld [vmem:[#allocation10 + $0x30] ss:$8 sps:$4 sm:$0xff]   ;;  %v1108_v30 = vld [vmem:[#allocation10 + $0x44] ss:$8 sps:$4 sm:$0xff]   ;;  %v469_v54 = vpack.c.bf16 %v1520_v22, %v1520_v22 }
  0x77   :  { %230 = vmatpush1.bf16.msra.mxu0 %v1078_v6  ;;  %v1106_v31 = vld [vmem:[#allocation10 + $0x40] ss:$8 sps:$4 sm:$0xff]   ;;  %v1111_v32 = vld [vmem:[#allocation10 + $0x54] ss:$8 sps:$4 sm:$0xff]   ;;  %v1109_v33 = vld [vmem:[#allocation10 + $0x50] ss:$8 sps:$4 sm:$0xff]  }
  0x78   :  { %231 = vmatprep.subr.bf16.mxu0 %v1079_v7  ;;  %v470_v26 = vpack.c.bf16 %v466_v24, %v466_v24  ;;  %v1114_v34 = vld [vmem:[#allocation10 + $0x64] ss:$8 sps:$4 sm:$0xff]   ;;  %v1112_v35 = vld [vmem:[#allocation10 + $0x60] ss:$8 sps:$4 sm:$0xff]   ;;  %v1117_v36 = vld [vmem:[#allocation10 + $0x74] ss:$8 sps:$4 sm:$0xff]  }
  0x79   :  { %v1115_v37 = vld [vmem:[#allocation10 + $0x70] ss:$8 sps:$4 sm:$0xff]   ;;  %v1120_v38 = vld [vmem:[#allocation10 + $0x84] ss:$8 sps:$4 sm:$0xff]   ;;  %v1118_v39 = vld [vmem:[#allocation10 + $0x80] ss:$8 sps:$4 sm:$0xff]  }
  0x7a   :  { %v1123_v40 = vld [vmem:[#allocation10 + $0x94] ss:$8 sps:$4 sm:$0xff]   ;;  %v1121_v41 = vld [vmem:[#allocation10 + $0x90] ss:$8 sps:$4 sm:$0xff]   ;;  %v1126_v42 = vld [vmem:[#allocation10 + $0xa4] ss:$8 sps:$4 sm:$0xff]  }
  0x7b   :  { %232 = vmatpush1.bf16.msra.mxu0 %v1081_v8  ;;  %v1124_v43 = vld [vmem:[#allocation10 + $0xa0] ss:$8 sps:$4 sm:$0xff]   ;;  %v1129_v44 = vld [vmem:[#allocation10 + $0xb4] ss:$8 sps:$4 sm:$0xff]   ;;  %v1127_v45 = vld [vmem:[#allocation10 + $0xb0] ss:$8 sps:$4 sm:$0xff]   ;;  %v135_v8 = vlaneseq }
  0x7c   :  { %233 = vmatprep.subr.bf16.mxu0 %v1082_v9  ;;  %v1132_v46 = vld [vmem:[#allocation10 + $0xc4] ss:$8 sps:$4 sm:$0xff]   ;;  %v1130_v47 = vld [vmem:[#allocation10 + $0xc0] ss:$8 sps:$4 sm:$0xff]   ;;  %v1135_v48 = vld [vmem:[#allocation10 + $0xd4] ss:$8 sps:$4 sm:$0xff]  }
  0x7d   :  { %v1133_v49 = vld [vmem:[#allocation10 + $0xd0] ss:$8 sps:$4 sm:$0xff]   ;;  %v1138_v50 = vld [vmem:[#allocation10 + $0xe4] ss:$8 sps:$4 sm:$0xff]   ;;  %v1136_v51 = vld [vmem:[#allocation10 + $0xe0] ss:$8 sps:$4 sm:$0xff]  }
  0x7e   :  { %v1141_v52 = vld [vmem:[#allocation10 + $0xf4] ss:$8 sps:$4 sm:$0xff]   ;;  %v1139_v53 = vld [vmem:[#allocation10 + $0xf0] ss:$8 sps:$4 sm:$0xff]   ;;  %v1142_v55 = vld [vmem:[#allocation8 + $0x40] sm:$0xff]   ;;  %v136_v9 = vshrl.u32 %v135_v8, 7 }
  0x7f   :  { %234 = vmatpush1.bf16.msra.mxu0 %v1084_v10  ;;  %v1143_v56 = vld [vmem:[#allocation8] sm:$0xff]   ;;  %1014 = vmatprep.subr.bf16.mxu1 %v1142_v55  ;;  %v1144_v57 = vld [vmem:[#allocation8 + $0x48] sm:$0xff]   ;;  %v1147_v60 = vld [vmem:[#allocation8 + $0x10] sm:$0xff]   ;;  %s1365_s29 = smov [#allocation13]  }
  0x80   :  { %235 = vmatprep.subr.bf16.mxu0 %v1085_v11  ;;  %1015 = vmatpush3.bf16.msra.mxu1 %v1143_v56  ;;  %v1145_v58 = vld [vmem:[#allocation8 + $0x8] sm:$0xff]   ;;  %v1148_v61 = vld [vmem:[#allocation8 + $0x58] sm:$0xff]   ;;  %v1150_v63 = vld [vmem:[#allocation8 + $0x60] sm:$0xff]   ;;  %v137_v10 = vsub.s32 0, %v136_v9  ;;  %s915_s4 = sshll.u32 %s1365_s29, 4  ;;  %s916_s4 = int_to_ptr.vmem [resolvable:$true] %s915_s4 }
  0x81   :  { %1016 = vmatprep.subr.bf16.mxu1 %v1144_v57  ;;  %v1149_v62 = vld [vmem:[#allocation8 + $0x18] sm:$0xff]   ;;  %v1151_v0 = vld [vmem:[#allocation8 + $0x20] sm:$0xff]   ;;  %v1152_v1 = vld [vmem:[#allocation8 + $0x68] sm:$0xff]   ;;  %s1322_s16 = scalar_lea.vmem %s916_s4, 32  ;;  %p1327_p7 = scmp.lt.s32.totalorder %s916_s4, %s916_s4 }
  0x82   :  { %v1153_v2 = vld [vmem:[#allocation8 + $0x28] sm:$0xff]   ;;  %v1154_v3 = vld [vmem:[#allocation8 + $0x70] sm:$0xff]   ;;  %v1156_v5 = vld [vmem:[#allocation8 + $0x78] sm:$0xff]   ;;  %p1323_p6 = scmp.ne.s32.totalorder %s916_s4, %s1322_s16  ;;  %p1328_p8 = scmp.lt.s32.totalorder %s1322_s16, %s1322_s16 }
  0x83   :  { %236 = vmatpush1.bf16.msra.mxu0 %v1087_v12  ;;  %v1155_v4 = vld [vmem:[#allocation8 + $0x30] sm:$0xff]   ;;  %v1157_v6 = vld [vmem:[#allocation8 + $0x38] sm:$0xff]   ;;  %v1158_v7 = vld [vmem:[#allocation11 + $0x40] sm:$0xff]   ;;  %v141_v12 = vsub.s32 1, %v136_v9 }
  0x84   :  { %237 = vmatprep.subr.bf16.mxu0 %v1088_v13  ;;  %1017 = vmatpush3.bf16.msra.mxu1 %v1145_v58  ;;  %v133_v11 = vld [vmem:[%s1553_s3] sm:$0x3]  ;;  %p1329_p9 = por %p1328_p8, %p1327_p7 }
  0x85   :  { %1018 = vmatprep.subr.bf16.mxu1 %v1146_v59  ;;  %v138_v13 = vrot.slane %v133_v11, %v137_v10 }
  0x86   :  { %p1330_p10 = pnand %p1329_p9, %p1323_p6 }
  0x87   :  { %238 = vmatpush1.bf16.msra.mxu0 %v1090_v14  ;;  %v142_v14 = vrot.slane %v133_v11, %v141_v12  ;;  %v945_v11 = vld [vmem:[%s1555_s5] ss:$0 sm:$0xff] }
  0x88   :  { %239 = vmatprep.subr.bf16.mxu0 %v1091_v15  ;;  %1019 = vmatpush3.bf16.msra.mxu1 %v1147_v60 }
  0x89   :  { %1020 = vmatprep.subr.bf16.mxu1 %v1148_v61 }
  0x8b   :  { %240 = vmatpush1.bf16.msra.mxu0 %v1093_v16 }
  0x8c   :  { %675 = vmatprep.subr.bf16.mxu0 %v1096_v18  ;;  %1021 = vmatpush3.bf16.msra.mxu1 %v1149_v62 }
  0x8d   :  { %1022 = vmatprep.subr.bf16.mxu1 %v1150_v63 }
  0x8e   :  { %258 = vmatmul.mubr.bf16.vlgmr.msra.gmra.mrb[0].mxu0 %v116_v19 }
  0x8f   :  { %676 = vmatpush1.bf16.msra.mxu0 %v1094_v20  ;;  %707 = vmatprep.mubr.bf16.mxu0 %v470_v26 }
  0x90   :  { %677 = vmatprep.subr.bf16.mxu0 %v1099_v21  ;;  %1023 = vmatpush3.bf16.msra.mxu1 %v1151_v0 }
  0x91   :  { %1024 = vmatprep.subr.bf16.mxu1 %v1152_v1 }
  0x93   :  { %678 = vmatpush1.bf16.msra.mxu0 %v1097_v23 }
  0x94   :  { %679 = vmatprep.subr.bf16.mxu0 %v1102_v25  ;;  %1025 = vmatpush3.bf16.msra.mxu1 %v1153_v2 }
  0x95   :  { %1026 = vmatprep.subr.bf16.mxu1 %v1154_v3 }
  0x97   :  { %680 = vmatpush1.bf16.msra.mxu0 %v1100_v27 }
  0x98   :  { %681 = vmatprep.subr.bf16.mxu0 %v1105_v28  ;;  %1027 = vmatpush3.bf16.msra.mxu1 %v1155_v4 }
  0x99   :  { %1028 = vmatprep.subr.bf16.mxu1 %v1156_v5 }
  0x9b   :  { %682 = vmatpush1.bf16.msra.mxu0 %v1103_v29 }
  0x9c   :  { %683 = vmatprep.subr.bf16.mxu0 %v1108_v30  ;;  %1029 = vmatpush3.bf16.msra.mxu1 %v1157_v6 }
  0x9d   :  { %1036 = vmatprep.subr.bf16.mxu1 %v1158_v7 }
  0x9f   :  { %684 = vmatpush1.bf16.msra.mxu0 %v1106_v31 }
  0xa0   :  { %685 = vmatprep.subr.bf16.mxu0 %v1111_v32  ;;  %v1159_v32 = vld [vmem:[#allocation11] sm:$0xff]  }
  0xa3   :  { %686 = vmatpush1.bf16.msra.mxu0 %v1109_v33 }
  0xa4   :  { %687 = vmatprep.subr.bf16.mxu0 %v1114_v34  ;;  %v1160_v34 = vld [vmem:[#allocation11 + $0x48] sm:$0xff]  }
  0xa7   :  { %688 = vmatpush1.bf16.msra.mxu0 %v1112_v35  ;;  %v1161_v35 = vld [vmem:[#allocation11 + $0x8] sm:$0xff]  }
  0xa8   :  { %689 = vmatprep.subr.bf16.mxu0 %v1117_v36  ;;  %v1162_v36 = vld [vmem:[#allocation11 + $0x50] sm:$0xff]  }
  0xab   :  { %690 = vmatpush1.bf16.msra.mxu0 %v1115_v37  ;;  %v1163_v37 = vld [vmem:[#allocation11 + $0x10] sm:$0xff]  }
  0xac   :  { %691 = vmatprep.subr.bf16.mxu0 %v1120_v38  ;;  %v1164_v38 = vld [vmem:[#allocation11 + $0x58] sm:$0xff]  }
  0xaf   :  { %692 = vmatpush1.bf16.msra.mxu0 %v1118_v39  ;;  %v1165_v39 = vld [vmem:[#allocation11 + $0x18] sm:$0xff]  }
  0xb0   :  { %693 = vmatprep.subr.bf16.mxu0 %v1123_v40  ;;  %v1166_v40 = vld [vmem:[#allocation11 + $0x60] sm:$0xff]  }
  0xb3   :  { %694 = vmatpush1.bf16.msra.mxu0 %v1121_v41  ;;  %v1167_v41 = vld [vmem:[#allocation11 + $0x20] sm:$0xff]  }
  0xb4   :  { %695 = vmatprep.subr.bf16.mxu0 %v1126_v42  ;;  %v1168_v42 = vld [vmem:[#allocation11 + $0x68] sm:$0xff]  }
  0xb7   :  { %696 = vmatpush1.bf16.msra.mxu0 %v1124_v43  ;;  %v1169_v43 = vld [vmem:[#allocation11 + $0x28] sm:$0xff]  }
  0xb8   :  { %697 = vmatprep.subr.bf16.mxu0 %v1129_v44  ;;  %v1170_v44 = vld [vmem:[#allocation11 + $0x70] sm:$0xff]  }
  0xbb   :  { %698 = vmatpush1.bf16.msra.mxu0 %v1127_v45  ;;  %v1171_v45 = vld [vmem:[#allocation11 + $0x30] sm:$0xff]  }
  0xbc   :  { %699 = vmatprep.subr.bf16.mxu0 %v1132_v46  ;;  %v1172_v46 = vld [vmem:[#allocation11 + $0x78] sm:$0xff]  }
  0xbf   :  { %700 = vmatpush1.bf16.msra.mxu0 %v1130_v47  ;;  %v503_v47 = vld [vmem:[%s1557_s7] sm:$0x3] }
  0xc0   :  { %701 = vmatprep.subr.bf16.mxu0 %v1135_v48  ;;  %v1173_v48 = vld [vmem:[#allocation11 + $0x38] sm:$0xff]  }
  0xc3   :  { %702 = vmatpush1.bf16.msra.mxu0 %v1133_v49  ;;  %v508_v49 = vrot.slane %v503_v47, %v137_v10 }
  0xc4   :  { %703 = vmatprep.subr.bf16.mxu0 %v1138_v50  ;;  %v512_v50 = vrot.slane %v503_v47, %v141_v12  ;;  %v997_v12 = vld [vmem:[%s1559_s9] ss:$0 sm:$0xff] }
  0xc7   :  { %704 = vmatpush1.bf16.msra.mxu0 %v1136_v51 }
  0xc8   :  { %705 = vmatprep.subr.bf16.mxu0 %v1141_v52 }
  0xcb   :  { %706 = vmatpush1.bf16.msra.mxu0 %v1139_v53 }
  0xce   :  { %708 = vmatmul.mubr.bf16.vlgmr.msra.gmra.mrb[4].mxu0 %v469_v54 }
 0x161   :  { %v259_v15 = vpop.f32.mrb[0].mxu0 }
 0x162   :  { %v260_v16 = vadd.f32 %v259_v15, %v138_v13  ;;  %v261_v17 = vpop.f32.mrb[1].mxu0 }
 0x163   :  { %v262_v18 = vadd.f32 %v261_v17, %v142_v14  ;;  %v263_v19 = vpop.f32.mrb[2].mxu0 }
 0x164   :  { %v943_v20 = vmul.f32 -1.442695, %v260_v16  ;;  %v264_v21 = vpop.f32.mrb[3].mxu0 }
 0x165   :  { %v944_v22 = vmul.f32 -1.442695, %v262_v18 }
 0x166   :  { %1174 = vpow2.f32 %v943_v20 }
 0x167   :  { %1176 = vpow2.f32 %v944_v22 }
 0x170   :  { %v1175_v23 = vpop.eup %1174 }
 0x171   :  { %v1177_v24 = vpop.eup %1176  ;;  %v272_v25 = vadd.f32 1.0, %v1175_v23 }
 0x172   :  { %v273_v26 = vadd.f32 1.0, %v1177_v24 }
 0x173   :  { %1178 = vrcp.f32 %v272_v25 }
 0x174   :  { %1180 = vrcp.f32 %v273_v26 }
 0x17d   :  { %v1179_v27 = vpop.eup %1178 }
 0x17e   :  { %v1181_v28 = vpop.eup %1180  ;;  %v278_v29 = vmul.f32 %v1179_v27, %v260_v16 }
 0x17f   :  { %v279_v30 = vmul.f32 %v1181_v28, %v262_v18 }
 0x180   :  { %v280_v33 = vpack.c.bf16 %v278_v29, %v278_v29 }
 0x181   :  { %v281_v31 = vpack.c.bf16 %v279_v30, %v279_v30 }
 0x183   :  { %449 = vmatprep.mubr.bf16.mxu1 %v281_v31 }
 0x184   :  { %450 = vmatmul.mubr.bf16.vlgmr.msra.gmra.mrb[0].mxu1 %v280_v33 }
 0x185   :  { %1037 = vmatpush3.bf16.msra.mxu1 %v1159_v32 }
 0x186   :  { %1038 = vmatprep.subr.bf16.mxu1 %v1160_v34 }
 0x189   :  { %1039 = vmatpush3.bf16.msra.mxu1 %v1161_v35 }
 0x18a   :  { %1040 = vmatprep.subr.bf16.mxu1 %v1162_v36 }
 0x18d   :  { %1041 = vmatpush3.bf16.msra.mxu1 %v1163_v37 }
 0x18e   :  { %1042 = vmatprep.subr.bf16.mxu1 %v1164_v38 }
 0x191   :  { %1043 = vmatpush3.bf16.msra.mxu1 %v1165_v39 }
 0x192   :  { %1044 = vmatprep.subr.bf16.mxu1 %v1166_v40 }
 0x195   :  { %1045 = vmatpush3.bf16.msra.mxu1 %v1167_v41 }
 0x196   :  { %1046 = vmatprep.subr.bf16.mxu1 %v1168_v42 }
 0x199   :  { %1047 = vmatpush3.bf16.msra.mxu1 %v1169_v43 }
 0x19a   :  { %1048 = vmatprep.subr.bf16.mxu1 %v1170_v44 }
 0x19d   :  { %1049 = vmatpush3.bf16.msra.mxu1 %v1171_v45 }
 0x19e   :  { %1050 = vmatprep.subr.bf16.mxu1 %v1172_v46 }
 0x1a1   :  { %v709_v51 = vpop.f32.mrb[4].mxu0  ;;  %1051 = vmatpush3.bf16.msra.mxu1 %v1173_v48 }
 0x1a2   :  { %v710_v52 = vadd.f32 %v709_v51, %v508_v49  ;;  %v711_v53 = vpop.f32.mrb[5].mxu0 }
 0x1a3   :  { %v712_v54 = vadd.f32 %v711_v53, %v512_v50  ;;  %v713_v55 = vpop.f32.mrb[6].mxu0 }
 0x1a4   :  { %v995_v56 = vmul.f32 -1.442695, %v710_v52  ;;  %v714_v57 = vpop.f32.mrb[7].mxu0 }
 0x1a5   :  { %v996_v58 = vmul.f32 -1.442695, %v712_v54 }
 0x1a6   :  { %1182 = vpow2.f32 %v995_v56 }
 0x1a7   :  { %1184 = vpow2.f32 %v996_v58 }
 0x1b0   :  { %v1183_v59 = vpop.eup %1182 }
 0x1b1   :  { %v1185_v60 = vpop.eup %1184  ;;  %v722_v61 = vadd.f32 1.0, %v1183_v59 }
 0x1b2   :  { %v723_v62 = vadd.f32 1.0, %v1185_v60 }
 0x1b3   :  { %1186 = vrcp.f32 %v722_v61 }
 0x1b4   :  { %1188 = vrcp.f32 %v723_v62 }
 0x1bd   :  { %v1187_v63 = vpop.eup %1186 }
 0x1be   :  { %v1189_v0 = vpop.eup %1188  ;;  %v728_v1 = vmul.f32 %v1187_v63, %v710_v52 }
 0x1bf   :  { %v729_v2 = vmul.f32 %v1189_v0, %v712_v54 }
 0x1c0   :  { %v730_v4 = vpack.c.bf16 %v728_v1, %v728_v1 }
 0x1c1   :  { %v731_v3 = vpack.c.bf16 %v729_v2, %v729_v2 }
 0x1c3   :  { %899 = vmatprep.mubr.bf16.mxu1 %v731_v3 }
 0x1c4   :  { %900 = vmatmul.mubr.bf16.vlgmr.msra.gmra.mrb[4].mxu1 %v730_v4 }
 0x257   :  { %v1030_v5 = vpop.f32.mrb[0].mxu1 }
 0x258   :  { %v1031_v6 = vpop.f32.mrb[1].mxu1 }
 0x259   :  { %v1032_v7 = vadd.f32 %v1031_v6, %v1030_v5  ;;  %v1033_v8 = vpop.f32.mrb[2].mxu1 }
 0x25a   :  { %v1034_v9 = vpop.f32.mrb[3].mxu1 }
 0x25b   :  { %v452_v17 = vadd.f32 %v1032_v7, %v945_v11 }
 0x297   :  { %v1052_v10 = vpop.f32.mrb[4].mxu1 }
 0x298   :  { %v1053_v13 = vpop.f32.mrb[5].mxu1 }
 0x299   :  { %v1054_v14 = vadd.f32 %v1053_v13, %v1052_v10  ;;  %v1055_v15 = vpop.f32.mrb[6].mxu1 }
 0x29a   :  { %v1056_v16 = vpop.f32.mrb[7].mxu1 }
 0x29b   :  { %v902_v18 = vadd.f32 %v1054_v14, %v997_v12 }
 0x29d   :  { %v907_v19 = vadd.f32 %v902_v18, %v452_v17 }
 0x29f   :  { %908 = vst [vmem:[#allocation13] sm:$0x3] %v907_v19 }
 0x2a0   :  { %1333 = shalt.err (!%p1330_p10)
}
 0x2a1   :  { %s1334_s30 = scalar_lea.hbm %s1560_s10, 32 }
 0x2a2   :  { %p1335_p11 = scmp.ne.s32.totalorder %s1560_s10, %s1334_s30  ;;  %p1338_p12 = scmp.lt.u32.totalorder %s1334_s30, %s1560_s10 }
 0x2a4   :  { %p1340_p13 = pnand %p1338_p12, %p1335_p11 }
 0x2a6   :  { %1343 = shalt.err (!%p1340_p13)
}
 0x2a7   :  { %918 = dma.vmem_to_hbm [thread:$0]  %s916_s4, 32, %s1560_s10, [#allocation4]  }
 0x2a8   :  { %1352 = dma.done.wait [#allocation4], 32  }
 0x2a9   :  { %1353 = vsyncadd [#allocation4], 4294967264 }
 0x2aa   :  { %922 = vsyncpa [#allocation3], 1 }
 0x2ab   :  { %923 = vsyncpa [#allocation6], 1 }
 0x2ac   :  { %924 = vsyncpa [#allocation9], 1 }
 0x2ad   :  { %925 = vsyncpa [#allocation12], 1 }
 0x2ae   :  { %926 = vsyncpa [#allocation4], 1 }

</bundles_post_ra>
